<compile_context>
chip_gen: v5e
topology: v5e:2x2
jax: 0.10.0
libtpu: 0.0.40
codegen_flags: <defaults>
</compile_context>

<pallas_src>
import jax
import jax.numpy as jnp
from jax.experimental import pallas as pl
from jax.experimental.pallas import tpu as pltpu

D_INPUT = 8
D_SHARED = 12
D_EXPERT = 23
BATCH = 4                      # matches NestedWrappedModule.get_input -> torch.rand(4, 8)

LANES = 128
PACK = LANES // D_INPUT        # 16 logical rows packed per 128-lane vreg row


def _round_up(n, m):
    return ((n + m - 1) // m) * m


def _fused_affine_kernel(x_ref, w_ref, b_ref, o_ref):
    # One MXU push (R,128)@(128,128) + one lane-dense VPU bias add per row tile.
    o_ref[...] = (
        jnp.dot(x_ref[...], w_ref[...], preferred_element_type=jnp.float32)
        + b_ref[...]
    )


def fuse_params(params):
    """Fold the 4 linear layers into one (W_f, b_f) affine map (host/XLA side, once)."""
    w1, b1, w2, b2, w3, b3, w4, b4 = params
    w_f = w1 @ w2 @ w3 @ w4                              # (8, 8)
    b_f = ((b1 @ w2 + b2) @ w3 + b3) @ w4 + b4           # (1, 8)
    return w_f, b_f


def fuse_params_lane_dense(params):
    """Lane-dense fused params: block-diagonal (128,128) weight + (1,128) bias."""
    w_f, b_f = fuse_params(params)
    w_big = jnp.kron(jnp.eye(PACK, dtype=jnp.float32), w_f)   # (128, 128) block-diag
    b_big = jnp.tile(b_f, (1, PACK))                           # (1, 128) pre-tiled bias
    return w_big, b_big


def mixture_of_experts_forward(x, fused_big, *, block_rows=2048):
    """x: (B, 8) f32;  fused_big = (W_big (128,128), b_big (1,128)).

    block_rows = packed (128-lane) rows per grid step.  2048 -> 1 MiB tiles, which
    double-buffered in+out stays well inside the scoped VMEM default on v5e/v6e/v7x.
    """
    w_big, b_big = fused_big
    B, D = x.shape
    assert D == D_INPUT

    # --- lane-dense repack: (B, 8) -> (R, 128), padding B up to a multiple of 16 ---
    b_pad = _round_up(B, PACK)
    if b_pad != B:
        x = jnp.pad(x, ((0, b_pad - B), (0, 0)))
    xp = x.reshape(b_pad // PACK, LANES)
    r = xp.shape[0]

    # --- row tiling: blk is a multiple of 8 (sublane), grid = cdiv with padding ---
    blk = min(block_rows, _round_up(r, 8))
    r_pad = _round_up(r, blk)
    if r_pad != r:
        xp = jnp.pad(xp, ((0, r_pad - r), (0, 0)))
    grid = (r_pad // blk,)

    out = pl.pallas_call(
        _fused_affine_kernel,
        out_shape=jax.ShapeDtypeStruct((r_pad, LANES), jnp.float32),
        grid=grid,
        in_specs=[
            pl.BlockSpec((blk, LANES), lambda i: (i, 0)),     # x row tile (lane-dense)
            pl.BlockSpec((LANES, LANES), lambda i: (0, 0)),   # fused block-diag weight (resident)
            pl.BlockSpec((1, LANES), lambda i: (0, 0)),       # pre-tiled bias (resident)
        ],
        out_specs=pl.BlockSpec((blk, LANES), lambda i: (i, 0)),
        compiler_params=pltpu.CompilerParams(
            dimension_semantics=("parallel",)),               # v7x: shard rows across both TCs
    )(xp, w_big, b_big)

    # --- unpack and drop padded (bias-only) rows ---
    return out.reshape(r_pad * PACK, D_INPUT)[:B]


def init_params(key):
    """Deterministic synthetic init (PyTorch-Linear-style uniform fan-in bound).

    Weights are stored transposed vs. PyTorch, i.e. (in_features, out_features).
    """
    dims = [(D_INPUT, D_SHARED),   # module[0]: Linear(8, 12)
            (D_SHARED, D_EXPERT),  # module[1] "shared": Linear(12, 23)
            (D_EXPERT, D_SHARED),  # module[2] "expert": Linear(23, 12)
            (D_SHARED, D_INPUT)]   # module[3]: Linear(12, 8)
    params = []
    for (d_in, d_out) in dims:
        key, kw, kb = jax.random.split(key, 3)
        bound = 1.0 / jnp.sqrt(jnp.float32(d_in))
        w = jax.random.uniform(kw, (d_in, d_out), jnp.float32, -bound, bound)
        b = jax.random.uniform(kb, (1, d_out), jnp.float32, -bound, bound)
        params += [w, b]
    return tuple(params)


def reference_forward(x, params):
    """Unfused reference — matches the PyTorch module's layer-by-layer forward."""
    w1, b1, w2, b2, w3, b3, w4, b4 = params
    h = x @ w1 + b1
    h = h @ w2 + b2
    h = h @ w3 + b3
    h = h @ w4 + b4
    return h


if __name__ == "__main__":
    key = jax.random.PRNGKey(0)
    key, kx, kx_big = jax.random.split(key, 3)
    params = init_params(key)
    fused_big = fuse_params_lane_dense(params)

    # Primary check: the module's own input shape, torch.rand(4, 8).
    x = jax.random.uniform(kx, (BATCH, D_INPUT), jnp.float32)
    y = jax.block_until_ready(mixture_of_experts_forward(x, fused_big))
    y_ref = reference_forward(x, params)
    assert y.shape == (BATCH, D_INPUT)
    assert jnp.allclose(y, y_ref, atol=2e-5, rtol=1e-4)

    # Secondary check: larger, non-multiple-of-16 batch exercises padding + multi-step grid.
    x_big = jax.random.uniform(kx_big, (1000, D_INPUT), jnp.float32)
    y_big = jax.block_until_ready(
        mixture_of_experts_forward(x_big, fused_big, block_rows=16))
    assert y_big.shape == (1000, D_INPUT)
    assert jnp.allclose(y_big, reference_forward(x_big, params), atol=2e-5, rtol=1e-4)

    print("KERNEL_OK")
</pallas_src>

<mosaic_0001>
module attributes {stable_mosaic.version = 11 : i64} {
  func.func @_fused_affine_kernel(%arg0: i32, %arg1: memref<8x128xf32, #tpu.memory_space<vmem>>, %arg2: memref<128x128xf32, #tpu.memory_space<vmem>>, %arg3: memref<1x128xf32, #tpu.memory_space<vmem>>, %arg4: memref<8x128xf32, #tpu.memory_space<vmem>>) attributes {dimension_semantics = [#tpu.dimension_semantics<parallel>], iteration_bounds = array<i64: 1>, scalar_prefetch = 0 : i64, scratch_operands = 0 : i64, tpu.core_type = #tpu.core_type<tc>, window_params = [{transform_indices = @transform_0, window_bounds = array<i64: 8, 128>}, {pipeline_mode = #tpu.pipeline_mode<synchronous>, transform_indices = @transform_1, window_bounds = array<i64: 128, 128>}, {pipeline_mode = #tpu.pipeline_mode<synchronous>, transform_indices = @transform_2, window_bounds = array<i64: 1, 128>}, {transform_indices = @transform_3, window_bounds = array<i64: 8, 128>}]} {
    %c0 = arith.constant 0 : index
    %c0_0 = arith.constant 0 : index
    %0 = vector.load %arg1[%c0, %c0_0] : memref<8x128xf32, #tpu.memory_space<vmem>>, vector<8x128xf32>
    %c0_1 = arith.constant 0 : index
    %c0_2 = arith.constant 0 : index
    %1 = vector.load %arg2[%c0_1, %c0_2] : memref<128x128xf32, #tpu.memory_space<vmem>>, vector<128x128xf32>
    %cst = arith.constant dense<0.000000e+00> : vector<8x128xf32>
    %2 = tpu.matmul %0, %1, %cst {dimension_numbers = #tpu.dot_dimension_numbers<[1], [0], [0], [1], [0, 0, 1, 1], [], []>} : vector<8x128xf32>, vector<128x128xf32>, vector<8x128xf32> -> vector<8x128xf32>
    %c0_3 = arith.constant 0 : index
    %c0_4 = arith.constant 0 : index
    %3 = vector.load %arg3[%c0_3, %c0_4] : memref<1x128xf32, #tpu.memory_space<vmem>>, vector<1x128xf32>
    %4 = vector.broadcast %3 : vector<1x128xf32> to vector<8x128xf32>
    %5 = arith.addf %2, %4 : vector<8x128xf32>
    %c0_5 = arith.constant 0 : index
    %c0_6 = arith.constant 0 : index
    %6 = vector.load %arg4[%c0_5, %c0_6] : memref<8x128xf32, #tpu.memory_space<vmem>>, vector<8x128xf32>
    tpu.vector_store %arg4[%c0_5, %c0_6], %5 {strides = array<i32>} : memref<8x128xf32, #tpu.memory_space<vmem>>, vector<8x128xf32>,
    return
  }
  func.func @transform_0(%arg0: i32) -> (i32, i32) {
    %c0_i32 = arith.constant 0 : i32
    %c0_i32_0 = arith.constant 0 : i32
    return %arg0, %c0_i32 : i32, i32
  }
  func.func @transform_1(%arg0: i32) -> (i32, i32) {
    %c0_i32 = arith.constant 0 : i32
    %c0_i32_0 = arith.constant 0 : i32
    %c0_i32_1 = arith.constant 0 : i32
    return %c0_i32, %c0_i32_0 : i32, i32
  }
  func.func @transform_2(%arg0: i32) -> (i32, i32) {
    %c0_i32 = arith.constant 0 : i32
    %c0_i32_0 = arith.constant 0 : i32
    %c0_i32_1 = arith.constant 0 : i32
    return %c0_i32, %c0_i32_0 : i32, i32
  }
  func.func @transform_3(%arg0: i32) -> (i32, i32) {
    %c0_i32 = arith.constant 0 : i32
    %c0_i32_0 = arith.constant 0 : i32
    return %arg0, %c0_i32 : i32, i32
  }
}

</mosaic_0001>

<bundles_post_ra>
// kernel: tpu_custom_call.1
= control target key start
LH: loop header
LB: loop body
LE: loop exit
PB: predicated region body
PF: predicated region fallthrough
CT: control target
= control target key end

     0   :  { %8 = vsyncpa [#allocation3], 0  ;;  %s226_s0 = inlined_call_operand.hbm [shape: f32[8,128], index: 0, kind: input, shape index: {}]   ;;  %s227_s1 = inlined_call_operand.hbm [shape: f32[128,128], index: 1, kind: input, shape index: {}]   ;;  %s228_s2 = inlined_call_operand.vmem [shape: f32[1,128], index: 2, kind: input, shape index: {}]   ;;  %s229_s3 = inlined_call_operand.hbm [shape: f32[8,128], index: 3, kind: output, shape index: {}]  }
   0x1   :  { %9 = vsyncpa [#allocation6], 0 }
   0x2   :  { %10 = vsyncpa [#allocation4], 0  ;;  %s16_s14 = sshll.u32 %s226_s0, 4  ;;  %s189_s15 = smov [#allocation2]   ;;  %s17_s14 = int_to_ptr.hbm [resolvable:$true] %s16_s14 }
   0x3   :  { %s18_s16 = sshll.u32 %s189_s15, 4  ;;  %s26_s19 = sshll.u32 %s227_s1, 4  ;;  %s19_s16 = int_to_ptr.vmem [resolvable:$true] %s18_s16  ;;  %s27_s19 = int_to_ptr.hbm [resolvable:$true] %s26_s19 }
   0x4   :  { %21 = dma.hbm_to_vmem [thread:$0]  %s17_s14, 128, %s19_s16, [#allocation3]  }
   0x5   :  { %s190_s20 = smov [#allocation5]   ;;  %s191_s22 = smov 128  }
   0x6   :  { %s28_s21 = sshll.u32 %s190_s20, 4  ;;  %s192_s23 = smov 8   ;;  %s29_s21 = int_to_ptr.vmem [resolvable:$true] %s28_s21 }
   0x7   :  { %34 = dma.hbm_to_vmem [thread:$0]  %s27_s19, 2048, %s29_s21, [#allocation6], %s191_s22, %s191_s22, %s192_s23  }
   0x8   :  { %183 = dma.done.wait [#allocation3], 128  }
   0x9   :  { %184 = vsyncadd [#allocation3], 4294967168 }
   0xa   :  { %185 = dma.done.wait [#allocation6], 2048  }
   0xb   :  { %186 = vsyncadd [#allocation6], 4294965248  ;;  %v61_v0 = vld [vmem:[#allocation5 + $0x78] sm:$0xff]  ;;  %v60_v1 = vld [vmem:[#allocation5 + $0x70] sm:$0xff]  ;;  %s193_s24 = smov [#allocation7]   ;;  %s94_s28 = sshll.u32 %s229_s3, 4  ;;  %s95_s28 = int_to_ptr.hbm [resolvable:$true] %s94_s28 }
   0xc   :  { %66 = vmatpush.msra.mxu0 %v61_v0  ;;  %v59_v2 = vld [vmem:[#allocation5 + $0x68] sm:$0xff]  ;;  %v58_v3 = vld [vmem:[#allocation5 + $0x60] sm:$0xff]  ;;  %v57_v4 = vld [vmem:[#allocation5 + $0x58] sm:$0xff]  ;;  %s92_s25 = sshll.u32 %s193_s24, 4  ;;  %s93_s25 = int_to_ptr.vmem [resolvable:$true] %s92_s25 }
   0xd   :  { %v56_v5 = vld [vmem:[#allocation5 + $0x50] sm:$0xff]  ;;  %v55_v6 = vld [vmem:[#allocation5 + $0x48] sm:$0xff]  ;;  %v54_v7 = vld [vmem:[#allocation5 + $0x40] sm:$0xff] }
   0xe   :  { %67 = vmatpush.msra.mxu0 %v60_v1  ;;  %v53_v8 = vld [vmem:[#allocation5 + $0x38] sm:$0xff]  ;;  %v52_v9 = vld [vmem:[#allocation5 + $0x30] sm:$0xff]  ;;  %v51_v10 = vld [vmem:[#allocation5 + $0x28] sm:$0xff] }
   0xf   :  { %v50_v11 = vld [vmem:[#allocation5 + $0x20] sm:$0xff]  ;;  %v49_v12 = vld [vmem:[#allocation5 + $0x18] sm:$0xff]  ;;  %v48_v13 = vld [vmem:[#allocation5 + $0x10] sm:$0xff] }
  0x10   :  { %68 = vmatpush.msra.mxu0 %v59_v2  ;;  %v47_v14 = vld [vmem:[#allocation5 + $0x8] sm:$0xff]  ;;  %v46_v15 = vld [vmem:[#allocation5] sm:$0xff]  ;;  %v45_v16 = vld [vmem:[#allocation2] sm:$0xff] }
  0x11   :  { %v110_v17 = vld [vmem:[%s228_s2] ss:$0 sm:$0xff] }
  0x12   :  { %69 = vmatpush.msra.mxu0 %v58_v3 }
  0x14   :  { %70 = vmatpush.msra.mxu0 %v57_v4 }
  0x16   :  { %71 = vmatpush.msra.mxu0 %v56_v5 }
  0x18   :  { %72 = vmatpush.msra.mxu0 %v55_v6 }
  0x1a   :  { %73 = vmatpush.msra.mxu0 %v54_v7 }
  0x1c   :  { %74 = vmatpush.msra.mxu0 %v53_v8 }
  0x1e   :  { %75 = vmatpush.msra.mxu0 %v52_v9 }
  0x20   :  { %76 = vmatpush.msra.mxu0 %v51_v10 }
  0x22   :  { %77 = vmatpush.msra.mxu0 %v50_v11 }
  0x24   :  { %78 = vmatpush.msra.mxu0 %v49_v12 }
  0x26   :  { %79 = vmatpush.msra.mxu0 %v48_v13 }
  0x28   :  { %80 = vmatpush.msra.mxu0 %v47_v14 }
  0x2a   :  { %81 = vmatpush.msra.mxu0 %v46_v15 }
  0x2b   :  { %82 = vmatmul.f32.vlgmr.msra.gmra.mxu0 %v45_v16 }
  0xa8   :  { %v83_v18 = vpop.f32.mrf.mxu0 }
  0xa9   :  { %v84_v19 = vadd.f32 %v110_v17, %v83_v18 }
  0xab   :  { %86 = vst [vmem:[#allocation7] sm:$0xff] %v84_v19 }
  0xac   :  { %97 = dma.vmem_to_hbm [thread:$0]  %s93_s25, 128, %s95_s28, [#allocation4]  }
  0xad   :  { %187 = dma.done.wait [#allocation4], 128  }
  0xae   :  { %188 = vsyncadd [#allocation4], 4294967168 }
  0xaf   :  { %102 = vsyncpa [#allocation3], 1 }
  0xb0   :  { %103 = vsyncpa [#allocation6], 1 }
  0xb1   :  { %104 = vsyncpa [#allocation4], 1 }

</bundles_post_ra>
